<compile_context>
chip_gen: v7x
topology: tpu7x:2x2x1
jax: 0.10.0
libtpu: 0.0.40
codegen_flags: <defaults>
</compile_context>

<pallas_src>
import jax
import jax.numpy as jnp
from jax.experimental import pallas as pl
from jax.experimental.pallas import tpu as pltpu


def _round_up(x, m):
    return (x + m - 1) // m * m


def _make_kernel(e_true):
    """e_true: the *unpadded* node-embedding size (mask comparison constant)."""

    def kernel(h_ref, w_ref, b_ref, node_ref, out_ref, sq_ref, cnt_ref):
        # regression_out = hidden @ W + b  (MXU matmul, f32 accumulate)
        reg = jnp.dot(h_ref[...], w_ref[...],
                      preferred_element_type=jnp.float32) + b_ref[...]
        out_ref[...] = reg.astype(out_ref.dtype)

        node = node_ref[...].astype(jnp.float32)
        # PyTorch rule: token valid iff sum(node_embedding) != node_embedding_size
        # ("no node" fill is all-ones over the unpadded E lanes; padded lanes are 0
        #  so the row sum is unchanged by the lane padding).
        row_sum = jnp.sum(node, axis=-1, keepdims=True)               # (TM, 1)
        valid = (row_sum != jnp.float32(e_true)).astype(jnp.float32)  # (TM, 1)

        diff = (reg - node) * valid                                   # mask rows
        sq = jnp.sum(diff * diff)                                     # scalar partial
        cnt = jnp.sum(valid)                                          # scalar partial

        # Per-grid-step partials, splatted over a lane-dense (1,8,128) tile.
        # No cross-step output dependency -> grid axis can be "parallel".
        sq_ref[...] = jnp.zeros_like(sq_ref) + sq
        cnt_ref[...] = jnp.zeros_like(cnt_ref) + cnt

    return kernel


def bert_kg_reg_head(hidden, w, bias, node_emb, reg_lambda=10.0,
                     tm=512, compute_dtype=None):
    """Returns (regression_out [B,S,E], reg_loss scalar).

    hidden   : [B, S, H]  BERT embedding-layer hidden states
    w, bias  : [H, E], [E] regression Linear parameters
    node_emb : [B, S, E]  KG node embedding per token (all-ones if no node)
    """
    B, S, H = hidden.shape
    E = node_emb.shape[-1]
    M = B * S

    # Row tile: as large as possible (default 512), padded grid.
    tm_eff = min(tm, _round_up(M, 8))
    Mp = _round_up(M, tm_eff)
    Ep = _round_up(E, 128)            # lane-dense feature dim
    G = Mp // tm_eff

    h2 = hidden.reshape(M, H)
    n2 = node_emb.reshape(M, E).astype(jnp.float32)
    w2, b2 = w, bias

    if Mp != M:
        h2 = jnp.pad(h2, ((0, Mp - M), (0, 0)))
        # Padded rows look like "no KG node" (all-ones) -> masked out of the loss.
        n2 = jnp.concatenate([n2, jnp.ones((Mp - M, E), n2.dtype)], axis=0)
    if Ep != E:
        # Zero-pad lanes: reg and node are both 0 there -> no loss contribution,
        # and the row sum (mask rule) is unchanged.
        n2 = jnp.pad(n2, ((0, 0), (0, Ep - E)))
        w2 = jnp.pad(w2, ((0, 0), (0, Ep - E)))
        b2 = jnp.pad(b2, ((0, Ep - E),))
    b2 = b2.reshape(1, Ep).astype(jnp.float32)

    if compute_dtype is not None:
        # e.g. jnp.bfloat16 on v6e/v7x: halves hidden/weight HBM traffic;
        # loss still accumulated from the f32 MXU result inside the kernel.
        h2 = h2.astype(compute_dtype)
        w2 = w2.astype(compute_dtype)

    # Explicit scoped-VMEM budget for the chosen tiles (double-buffered inputs/
    # output + resident weight/bias + partial tiles), capped at 64 MiB so the
    # same value is safe on v7x (64 MiB physical) as well as v5e/v6e.
    isz = jnp.dtype(h2.dtype).itemsize
    per_step = tm_eff * (H * isz + 2 * Ep * 4)          # hidden + node + out tiles
    resident = H * Ep * isz + Ep * 4 + 2 * 2 * 8 * 128 * 4
    vmem_limit = int(min(max(2 * per_step + resident + (8 << 20), 32 << 20),
                         64 << 20))

    out, sq_p, cnt_p = pl.pallas_call(
        _make_kernel(float(E)),
        out_shape=(
            jax.ShapeDtypeStruct((Mp, Ep), jnp.float32),
            jax.ShapeDtypeStruct((G, 8, 128), jnp.float32),
            jax.ShapeDtypeStruct((G, 8, 128), jnp.float32),
        ),
        grid_spec=pltpu.PrefetchScalarGridSpec(
            num_scalar_prefetch=0,
            grid=(G,),
            in_specs=[
                pl.BlockSpec((tm_eff, H), lambda i: (i, 0)),      # hidden tile
                pl.BlockSpec((H, Ep), lambda i: (0, 0)),          # weight (resident)
                pl.BlockSpec((1, Ep), lambda i: (0, 0)),          # bias (resident)
                pl.BlockSpec((tm_eff, Ep), lambda i: (i, 0)),     # node-emb tile
            ],
            out_specs=[
                pl.BlockSpec((tm_eff, Ep), lambda i: (i, 0)),     # regression out
                pl.BlockSpec((1, 8, 128), lambda i: (i, 0, 0)),   # sq partial
                pl.BlockSpec((1, 8, 128), lambda i: (i, 0, 0)),   # cnt partial
            ],
        ),
        compiler_params=pltpu.CompilerParams(
            dimension_semantics=("parallel",),       # no cross-step deps left
            vmem_limit_bytes=vmem_limit),
    )(h2, w2, b2, n2)

    regression_out = out[:M, :E].reshape(B, S, E)
    sqsum = jnp.sum(sq_p[:, 0, 0])
    cnt = jnp.sum(cnt_p[:, 0, 0])
    # MSELoss(mean) over the masked rows: N_valid * E elements (guard cnt==0).
    reg_loss = reg_lambda * sqsum / (jnp.maximum(cnt, 1.0) * jnp.float32(E))
    return regression_out, reg_loss


def _reference(hidden, w, bias, node_emb, reg_lambda):
    reg = jnp.einsum("bsh,he->bse", hidden, w) + bias
    E = node_emb.shape[-1]
    valid = jnp.sum(node_emb, axis=-1) != jnp.float32(E)
    diff = (reg - node_emb) * valid[..., None]
    loss = reg_lambda * jnp.sum(diff * diff) / (jnp.sum(valid) * E)
    return reg, loss


if __name__ == "__main__":
    # Small shapes implied by the forward: batch B, seq S, BERT hidden H,
    # KG node embedding size E.
    B, S, H, E = 2, 8, 32, 32
    reg_lambda = 10.0

    key = jax.random.PRNGKey(0)
    k_h, k_w, k_b, k_n, k_m = jax.random.split(key, 5)

    # Stand-in for outputs['hidden_states'][0] (BERT embedding-layer output).
    hidden = jax.random.normal(k_h, (B, S, H), dtype=jnp.float32)
    # Deterministic regression-model parameters (Linear H -> E).
    w = 0.05 * jax.random.normal(k_w, (H, E), dtype=jnp.float32)
    bias = 0.05 * jax.random.normal(k_b, (E,), dtype=jnp.float32)
    # KG node embeddings; tokens without a node get torch.full(..., 1.0).
    node_emb = jax.random.normal(k_n, (B, S, E), dtype=jnp.float32)
    no_node = jax.random.bernoulli(k_m, 0.4, (B, S))
    node_emb = jnp.where(no_node[..., None], jnp.ones_like(node_emb), node_emb)

    reg_out, reg_loss = bert_kg_reg_head(hidden, w, bias, node_emb, reg_lambda)
    jax.block_until_ready((reg_out, reg_loss))

    ref_out, ref_loss = _reference(hidden, w, bias, node_emb, reg_lambda)
    assert jnp.allclose(reg_out, ref_out, atol=1e-4, rtol=1e-4)
    assert jnp.allclose(reg_loss, ref_loss, atol=1e-4, rtol=1e-4)

    # TODO(synk): tokenizer decode, WordNet/Wikidata node lookup and the BERT
    # encoder itself are external host-side models with no Pallas equivalent.
    print("KERNEL_OK")
</pallas_src>

<mosaic_0001>
module attributes {stable_mosaic.version = 11 : i64} {
  func.func @kernel(%arg0: i32, %arg1: memref<16x32xf32, #tpu.memory_space<vmem>>, %arg2: memref<32x128xf32, #tpu.memory_space<vmem>>, %arg3: memref<1x128xf32, #tpu.memory_space<vmem>>, %arg4: memref<16x128xf32, #tpu.memory_space<vmem>>, %arg5: memref<16x128xf32, #tpu.memory_space<vmem>>, %arg6: memref<1x8x128xf32, #tpu.memory_space<vmem>>, %arg7: memref<1x8x128xf32, #tpu.memory_space<vmem>>) attributes {dimension_semantics = [#tpu.dimension_semantics<parallel>], iteration_bounds = array<i64: 1>, scalar_prefetch = 0 : i64, scratch_operands = 0 : i64, tpu.core_type = #tpu.core_type<tc>, window_params = [{transform_indices = @transform_0, window_bounds = array<i64: 16, 32>}, {pipeline_mode = #tpu.pipeline_mode<synchronous>, transform_indices = @transform_1, window_bounds = array<i64: 32, 128>}, {pipeline_mode = #tpu.pipeline_mode<synchronous>, transform_indices = @transform_2, window_bounds = array<i64: 1, 128>}, {transform_indices = @transform_3, window_bounds = array<i64: 16, 128>}, {transform_indices = @transform_4, window_bounds = array<i64: 16, 128>}, {transform_indices = @transform_5, window_bounds = array<i64: 1, 8, 128>}, {transform_indices = @transform_6, window_bounds = array<i64: 1, 8, 128>}]} {
    %c0 = arith.constant 0 : index
    %c0_0 = arith.constant 0 : index
    %0 = vector.load %arg1[%c0, %c0_0] : memref<16x32xf32, #tpu.memory_space<vmem>>, vector<16x32xf32>
    %c0_1 = arith.constant 0 : index
    %c0_2 = arith.constant 0 : index
    %1 = vector.load %arg2[%c0_1, %c0_2] : memref<32x128xf32, #tpu.memory_space<vmem>>, vector<32x128xf32>
    %cst = arith.constant dense<0.000000e+00> : vector<16x128xf32>
    %2 = tpu.matmul %0, %1, %cst {dimension_numbers = #tpu.dot_dimension_numbers<[1], [0], [0], [1], [0, 0, 1, 1], [], []>} : vector<16x32xf32>, vector<32x128xf32>, vector<16x128xf32> -> vector<16x128xf32>
    %c0_3 = arith.constant 0 : index
    %c0_4 = arith.constant 0 : index
    %3 = vector.load %arg3[%c0_3, %c0_4] : memref<1x128xf32, #tpu.memory_space<vmem>>, vector<1x128xf32>
    %4 = vector.broadcast %3 : vector<1x128xf32> to vector<16x128xf32>
    %5 = arith.addf %2, %4 : vector<16x128xf32>
    %c0_5 = arith.constant 0 : index
    %c0_6 = arith.constant 0 : index
    %6 = vector.load %arg5[%c0_5, %c0_6] : memref<16x128xf32, #tpu.memory_space<vmem>>, vector<16x128xf32>
    tpu.vector_store %arg5[%c0_5, %c0_6], %5 {strides = array<i32>} : memref<16x128xf32, #tpu.memory_space<vmem>>, vector<16x128xf32>,
    %c0_7 = arith.constant 0 : index
    %c0_8 = arith.constant 0 : index
    %7 = vector.load %arg4[%c0_7, %c0_8] : memref<16x128xf32, #tpu.memory_space<vmem>>, vector<16x128xf32>
    %cst_9 = arith.constant dense<0.000000e+00> : vector<16xf32>
    %8 = vector.multi_reduction <add>, %7, %cst_9 [1] : vector<16x128xf32> to vector<16xf32>
    %9 = vector.shape_cast %8 : vector<16xf32> to vector<16x1xf32>
    %cst_10 = arith.constant 3.200000e+01 : f32
    %10 = vector.broadcast %cst_10 : f32 to vector<16x1xf32>
    %11 = arith.cmpf one, %9, %10 : vector<16x1xf32>
    %12 = arith.extui %11 : vector<16x1xi1> to vector<16x1xi32>
    %13 = arith.sitofp %12 : vector<16x1xi32> to vector<16x1xf32>
    %14 = arith.subf %5, %7 : vector<16x128xf32>
    %15 = vector.broadcast %13 : vector<16x1xf32> to vector<16x128xf32>
    %16 = arith.mulf %14, %15 : vector<16x128xf32>
    %17 = arith.mulf %16, %16 : vector<16x128xf32>
    %18 = vector.shape_cast %17 : vector<16x128xf32> to vector<1x16x128xf32>
    %cst_11 = arith.constant dense<0.000000e+00> : vector<1xf32>
    %19 = vector.multi_reduction <add>, %18, %cst_11 [1, 2] : vector<1x16x128xf32> to vector<1xf32>
    %20 = vector.shape_cast %19 : vector<1xf32> to vector<1x1x1xf32>
    %21 = vector.extract %20[0, 0, 0] : f32 from vector<1x1x1xf32>
    %22 = vector.shape_cast %13 : vector<16x1xf32> to vector<1x16x1xf32>
    %cst_12 = arith.constant dense<0.000000e+00> : vector<1xf32>
    %23 = vector.multi_reduction <add>, %22, %cst_12 [1, 2] : vector<1x16x1xf32> to vector<1xf32>
    %24 = vector.shape_cast %23 : vector<1xf32> to vector<1x1x1xf32>
    %25 = vector.extract %24[0, 0, 0] : f32 from vector<1x1x1xf32>
    %cst_13 = arith.constant 0.000000e+00 : f32
    %26 = vector.broadcast %cst_13 : f32 to vector<1x8x128xf32>
    %27 = vector.broadcast %21 : f32 to vector<1x8x128xf32>
    %28 = arith.addf %26, %27 : vector<1x8x128xf32>
    %c0_14 = arith.constant 0 : index
    %c0_15 = arith.constant 0 : index
    %c0_16 = arith.constant 0 : index
    %29 = vector.load %arg6[%c0_14, %c0_15, %c0_16] : memref<1x8x128xf32, #tpu.memory_space<vmem>>, vector<1x8x128xf32>
    tpu.vector_store %arg6[%c0_14, %c0_15, %c0_16], %28 {strides = array<i32>} : memref<1x8x128xf32, #tpu.memory_space<vmem>>, vector<1x8x128xf32>,
    %cst_17 = arith.constant 0.000000e+00 : f32
    %30 = vector.broadcast %cst_17 : f32 to vector<1x8x128xf32>
    %31 = vector.broadcast %25 : f32 to vector<1x8x128xf32>
    %32 = arith.addf %30, %31 : vector<1x8x128xf32>
    %c0_18 = arith.constant 0 : index
    %c0_19 = arith.constant 0 : index
    %c0_20 = arith.constant 0 : index
    %33 = vector.load %arg7[%c0_18, %c0_19, %c0_20] : memref<1x8x128xf32, #tpu.memory_space<vmem>>, vector<1x8x128xf32>
    tpu.vector_store %arg7[%c0_18, %c0_19, %c0_20], %32 {strides = array<i32>} : memref<1x8x128xf32, #tpu.memory_space<vmem>>, vector<1x8x128xf32>,
    return
  }
  func.func @transform_0(%arg0: i32) -> (i32, i32) {
    %c0_i32 = arith.constant 0 : i32
    %c0_i32_0 = arith.constant 0 : i32
    return %arg0, %c0_i32 : i32, i32
  }
  func.func @transform_1(%arg0: i32) -> (i32, i32) {
    %c0_i32 = arith.constant 0 : i32
    %c0_i32_0 = arith.constant 0 : i32
    %c0_i32_1 = arith.constant 0 : i32
    return %c0_i32, %c0_i32_0 : i32, i32
  }
  func.func @transform_2(%arg0: i32) -> (i32, i32) {
    %c0_i32 = arith.constant 0 : i32
    %c0_i32_0 = arith.constant 0 : i32
    %c0_i32_1 = arith.constant 0 : i32
    return %c0_i32, %c0_i32_0 : i32, i32
  }
  func.func @transform_3(%arg0: i32) -> (i32, i32) {
    %c0_i32 = arith.constant 0 : i32
    %c0_i32_0 = arith.constant 0 : i32
    return %arg0, %c0_i32 : i32, i32
  }
  func.func @transform_4(%arg0: i32) -> (i32, i32) {
    %c0_i32 = arith.constant 0 : i32
    %c0_i32_0 = arith.constant 0 : i32
    return %arg0, %c0_i32 : i32, i32
  }
  func.func @transform_5(%arg0: i32) -> (i32, i32, i32) {
    %c0_i32 = arith.constant 0 : i32
    %c0_i32_0 = arith.constant 0 : i32
    %c0_i32_1 = arith.constant 0 : i32
    return %arg0, %c0_i32, %c0_i32_0 : i32, i32, i32
  }
  func.func @transform_6(%arg0: i32) -> (i32, i32, i32) {
    %c0_i32 = arith.constant 0 : i32
    %c0_i32_0 = arith.constant 0 : i32
    %c0_i32_1 = arith.constant 0 : i32
    return %arg0, %c0_i32, %c0_i32_0 : i32, i32, i32
  }
}

</mosaic_0001>

<bundles_post_ra>
// kernel: tpu_custom_call.1
= control target key start
LH: loop header
LB: loop body
LE: loop exit
PB: predicated region body
PF: predicated region fallthrough
CT: control target
= control target key end

     0   :  { %12 = vsyncpa [#allocation3], 0  ;;  %s575_s0 = inlined_call_operand.hbm [shape: f32[16,32], index: 0, kind: input, shape index: {}]   ;;  %s576_s1 = inlined_call_operand.hbm [shape: f32[32,128], index: 1, kind: input, shape index: {}]   ;;  %s577_s2 = inlined_call_operand.vmem [shape: f32[1,128], index: 2, kind: input, shape index: {}]   ;;  %s578_s3 = inlined_call_operand.hbm [shape: f32[16,128], index: 3, kind: input, shape index: {}]   ;;  %s579_s4 = inlined_call_operand.hbm [shape: f32[16,128], index: 4, kind: output, shape index: {0}]   ;;  %s580_s5 = inlined_call_operand.hbm [shape: f32[1,8,128], index: 5, kind: output, shape index: {1}]   ;;  %s581_s6 = inlined_call_operand.hbm [shape: f32[1,8,128], index: 6, kind: output, shape index: {2}]  }
   0x1   :  { %13 = vsyncpa [#allocation6], 0 }
   0x2   :  { %14 = vsyncpa [#allocation4], 0 }
   0x3   :  { %15 = vsyncpa [#allocation10], 0  ;;  %s435_s21 = smov [#allocation5]   ;;  %s436_s23 = smov [#allocation2]  }
   0x4   :  { %s33_s22 = sshll.u32 %s435_s21, 4  ;;  %s21_s24 = sshll.u32 %s436_s23, 4  ;;  %s34_s22 = int_to_ptr.vmem [resolvable:$true] %s33_s22  ;;  %s479_s24 = int_to_ptr.vmem [resolvable:$true] %s21_s24 }
   0x5   :  { %s295_s27 = scalar_lea.hbm %s576_s1, 512 }
   0x6   :  { %p296_p0 = scmp.ne.s32.totalorder %s576_s1, %s295_s27  ;;  %p299_p1 = scmp.lt.u32.totalorder %s295_s27, %s576_s1 }
   0x8   :  { %p301_p2 = pnand %p299_p1, %p296_p0 }
   0xa   :  { %304 = shalt.err (!%p301_p2)
}
   0xb   :  { %s305_s8 = scalar_lea.vmem %s34_s22, 512  ;;  %p310_p4 = scmp.lt.s32.totalorder %s34_s22, %s34_s22 }
   0xc   :  { %p306_p3 = scmp.ne.s32.totalorder %s34_s22, %s305_s8  ;;  %p311_p5 = scmp.lt.s32.totalorder %s305_s8, %s305_s8 }
   0xe   :  { %p312_p6 = por %p311_p5, %p310_p4 }
  0x10   :  { %p313_p7 = pnand %p312_p6, %p306_p3 }
  0x12   :  { %316 = shalt.err (!%p313_p7)
}
  0x13   :  { %s437_s9 = smov 128   ;;  %s438_s10 = smov 8  }
  0x14   :  { %39 = dma.hbm_to_vmem [thread:$0]  %s576_s1, 512, %s34_s22, [#allocation6], %s437_s9, %s437_s9, %s438_s10  }
  0x15   :  { %s317_s15 = scalar_lea.hbm %s575_s0, 256 }
  0x16   :  { %p318_p8 = scmp.ne.s32.totalorder %s575_s0, %s317_s15  ;;  %p321_p9 = scmp.lt.u32.totalorder %s317_s15, %s575_s0 }
  0x18   :  { %p323_p10 = pnand %p321_p9, %p318_p8 }
  0x1a   :  { %326 = shalt.err (!%p323_p10)
}
  0x1b   :  { %s327_s20 = scalar_lea.vmem %s479_s24, 256  ;;  %p332_p12 = scmp.lt.s32.totalorder %s479_s24, %s479_s24 }
  0x1c   :  { %p328_p11 = scmp.ne.s32.totalorder %s479_s24, %s327_s20  ;;  %p333_p13 = scmp.lt.s32.totalorder %s327_s20, %s327_s20 }
  0x1e   :  { %p334_p0 = por %p333_p13, %p332_p12 }
  0x20   :  { %p335_p1 = pnand %p334_p0, %p328_p11 }
  0x22   :  { %338 = shalt.err (!%p335_p1)
}
  0x23   :  { %27 = dma.hbm_to_vmem [thread:$0]  %s575_s0, 256, %s479_s24, [#allocation3], %s437_s9, %s437_s9, %s438_s10  }
  0x24   :  { %s439_s22 = smov [#allocation7]   ;;  %s339_s27 = scalar_lea.hbm %s578_s3, 256 }
  0x25   :  { %s47_s23 = sshll.u32 %s439_s22, 4  ;;  %p340_p2 = scmp.ne.s32.totalorder %s578_s3, %s339_s27  ;;  %s48_s23 = int_to_ptr.vmem [resolvable:$true] %s47_s23 }
  0x26   :  { %p343_p3 = scmp.lt.u32.totalorder %s339_s27, %s578_s3 }
  0x28   :  { %p345_p4 = pnand %p343_p3, %p340_p2 }
  0x2a   :  { %348 = shalt.err (!%p345_p4)
}
  0x2b   :  { %s349_s8 = scalar_lea.vmem %s48_s23, 256  ;;  %p354_p6 = scmp.lt.s32.totalorder %s48_s23, %s48_s23 }
  0x2c   :  { %p350_p5 = scmp.ne.s32.totalorder %s48_s23, %s349_s8  ;;  %p355_p7 = scmp.lt.s32.totalorder %s349_s8, %s349_s8 }
  0x2e   :  { %p356_p8 = por %p355_p7, %p354_p6 }
  0x30   :  { %p357_p9 = pnand %p356_p8, %p350_p5 }
  0x32   :  { %360 = shalt.err (!%p357_p9)
}
  0x33   :  { %53 = dma.hbm_to_vmem [thread:$0]  %s578_s3, 256, %s48_s23, [#allocation6], %s437_s9, %s437_s9, %s438_s10  }
  0x34   :  { %427 = dma.done.wait [#allocation3], 256  }
  0x35   :  { %428 = vsyncadd [#allocation3], 4294967040 }
  0x36   :  { %429 = dma.done.wait [#allocation6], 768  }
  0x37   :  { %430 = vsyncadd [#allocation6], 4294966528  ;;  %vm76_vm0 = vcmask 261120   ;;  %v65_v0 = vld [vmem:[#allocation5] sm:$0xff]  ;;  %v66_v1 = vld [vmem:[#allocation5 + $0x8] sm:$0xff]  ;;  %v440_v18 = vmov 0.0  }
  0x38   :  { %v67_v2 = vld [vmem:[#allocation5 + $0x10] sm:$0xff]  ;;  %v274_v3 = vpack.c.bf16 %v66_v1, %v65_v0  ;;  %v68_v4 = vld [vmem:[#allocation5 + $0x18] sm:$0xff]  ;;  %v160_v7 = vld [vmem:[#allocation7] sm:$0xff]  ;;  %vm188_vm3 = vcmask 7168  }
  0x39   :  { %v63_v5 = vld [vmem:[#allocation2] sm:$0xff]  ;;  %v278_v6 = vpack.c.bf16 %v68_v4, %v67_v2  ;;  %162 = vadd.xlane.f32.xlu0 %v160_v7  ;;  %v161_v8 = vld [vmem:[#allocation7 + $0x8] sm:$0xff]  ;;  %v64_v9 = vld [vmem:[#allocation2 + $0x8] sm:$0xff] }
  0x3a   :  { %271 = vmatprep.mubr.msk.f32.mxu0 %vm76_vm0, %v63_v5  ;;  %275 = vmatprep.subr.bf16.mxu0 %v274_v3  ;;  %v252_v12 = vld [vmem:[%s577_s2] ss:$0 sm:$0xff]  ;;  %s441_s2 = smov [#allocation8]  }
  0x3b   :  { %277 = vmatpush3.bf16.msra.mxu0 %v274_v3  ;;  %s212_s12 = sshll.u32 %s441_s2, 4  ;;  %s213_s12 = int_to_ptr.vmem [resolvable:$true] %s212_s12 }
  0x3c   :  { %279 = vmatprep.subr.bf16.mxu0 %v278_v6  ;;  %s361_s13 = scalar_lea.vmem %s213_s12, 256  ;;  %p366_p11 = scmp.lt.s32.totalorder %s213_s12, %s213_s12 }
  0x3d   :  { %164 = vadd.xlane.f32.xlu0 %v161_v8  ;;  %p362_p10 = scmp.ne.s32.totalorder %s213_s12, %s361_s13  ;;  %p367_p12 = scmp.lt.s32.totalorder %s361_s13, %s361_s13 }
  0x3f   :  { %281 = vmatpush3.bf16.msra.mxu0 %v278_v6  ;;  %p368_p13 = por %p367_p12, %p366_p11 }
  0x41   :  { %p369_p0 = pnand %p368_p13, %p362_p10 }
  0x42   :  { %272 = vmatmul.mubr.msk.f32.vlgmr.msra.gmra.mrb[0].mxu0 %vm76_vm0, %v64_v9 }
  0xc6   :  { %v163_v10 = vpop.xlane.xlu0 %162 }
  0xc7   :  { %vm166_vm2 = vcmp.ne.f32.partialorder %v163_v10, 32.0 }
  0xc8   :  { %v255_v21 = vsel %vm166_vm2, 1.0, %v440_v18 }
  0xc9   :  { %v189_v28 = vsel %vm188_vm3, %v255_v21, 0.0 }
  0xca   :  { %v165_v11 = vpop.xlane.xlu0 %164 }
  0xcb   :  { %vm167_vm1 = vcmp.ne.f32.partialorder %v165_v11, 32.0 }
  0xcc   :  { %v256_v19 = vsel %vm167_vm1, 1.0, %v440_v18 }
  0xcd   :  { %v190_v27 = vsel %vm188_vm3, %v256_v19, 0.0 }
  0xce   :  { %v191_v29 = vadd.f32 %v190_v27, %v189_v28 }
 0x115   :  { %v273_v13 = vpop.f32.mrb[0].mxu0 }
 0x116   :  { %v155_v14 = vadd.f32 %v273_v13, %v252_v12  ;;  %v149_v15 = vpop.f32.mrb[1].mxu0 }
 0x117   :  { %v150_v16 = vadd.f32 %v252_v12, %v149_v15 }
 0x118   :  { %159 = vst [vmem:[#allocation8 + $0x8] sm:$0xff] %v155_v14  ;;  %v173_v17 = vsub.f32 %v155_v14, %v161_v8 }
 0x119   :  { %158 = vst [vmem:[#allocation8] sm:$0xff] %v150_v16  ;;  %v172_v20 = vsub.f32 %v150_v16, %v160_v7 }
 0x11a   :  { %v175_v22 = vmul.f32 %v256_v19, %v173_v17 }
 0x11b   :  { %v174_v23 = vmul.f32 %v255_v21, %v172_v20 }
 0x11c   :  { %v177_v24 = vmul.f32 %v175_v22, %v175_v22 }
 0x11d   :  { %v176_v25 = vmul.f32 %v174_v23, %v174_v23 }
 0x11f   :  { %v178_v26 = vadd.f32 %v177_v24, %v176_v25 }
 0x121   :  { %179 = vadd.xlane.f32.xlu1 %v178_v26 }
 0x125   :  { %192 = vadd.xlane.f32.xlu1 %v191_v29 }
 0x126   :  { %372 = shalt.err (!%p369_p0)
}
 0x127   :  { %s373_s16 = scalar_lea.hbm %s579_s4, 256 }
 0x128   :  { %p374_p1 = scmp.ne.s32.totalorder %s579_s4, %s373_s16  ;;  %p377_p2 = scmp.lt.u32.totalorder %s373_s16, %s579_s4 }
 0x12a   :  { %p379_p3 = pnand %p377_p2, %p374_p1 }
 0x12c   :  { %382 = shalt.err (!%p379_p3)
}
 0x12d   :  { %218 = dma.vmem_to_hbm [thread:$0]  %s213_s12, 256, %s579_s4, [#allocation4], %s437_s9, %s437_s9, %s438_s10  }
 0x12e   :  { %s442_s22 = smov [#allocation9]   ;;  %s443_s4 = smov [#allocation11]  }
 0x12f   :  { %s225_s23 = sshll.u32 %s442_s22, 4  ;;  %s235_s9 = sshll.u32 %s443_s4, 4  ;;  %s226_s23 = int_to_ptr.vmem [resolvable:$true] %s225_s23  ;;  %s236_s9 = int_to_ptr.vmem [resolvable:$true] %s235_s9 }
 0x130   :  { %s383_s10 = scalar_lea.vmem %s226_s23, 128  ;;  %p388_p5 = scmp.lt.s32.totalorder %s226_s23, %s226_s23 }
 0x131   :  { %p384_p4 = scmp.ne.s32.totalorder %s226_s23, %s383_s10  ;;  %p389_p6 = scmp.lt.s32.totalorder %s383_s10, %s383_s10 }
 0x133   :  { %p390_p7 = por %p389_p6, %p388_p5 }
 0x135   :  { %p391_p8 = pnand %p390_p7, %p384_p4 }
 0x1ae   :  { %v180_v30 = vpop.xlane.xlu1 %179 }
 0x1af   :  { %v181_v31 = vrot.slane %v180_v30, 4 }
 0x1b1   :  { %v182_v32 = vadd.f32 %v181_v31, %v180_v30 }
 0x1b2   :  { %v193_v33 = vpop.xlane.xlu1 %192 }
 0x1b3   :  { %v183_v34 = vrot.slane %v182_v32, 2  ;;  %v194_v35 = vrot.slane %v193_v33, 4 }
 0x1b5   :  { %v195_v36 = vadd.f32 %v194_v35, %v193_v33  ;;  %v184_v37 = vadd.f32 %v183_v34, %v182_v32 }
 0x1b7   :  { %v196_v38 = vrot.slane %v195_v36, 2  ;;  %v185_v39 = vrot.slane %v184_v37, 1 }
 0x1b9   :  { %v197_v40 = vadd.f32 %v196_v38, %v195_v36  ;;  %v186_v41 = vadd.f32 %v185_v39, %v184_v37 }
 0x1bb   :  { %282 = vpush %v186_v41  ;;  %v198_v42 = vrot.slane %v197_v40, 1 }
 0x1bd   :  { %v199_v43 = vadd.f32 %v198_v42, %v197_v40 }
 0x1bf   :  { %284 = vpush %v199_v43 }
 0x1ec   :  { %s283_s25 = spop %282 }
 0x1ed   :  { %v201_v44 = vstv %s283_s25 }
 0x1ee   :  { %203 = vst [vmem:[#allocation9] sm:$0xff] %v201_v44 }
 0x1ef   :  { %394 = shalt.err (!%p391_p8)
}
 0x1f0   :  { %s395_s28 = scalar_lea.hbm %s580_s5, 128 }
 0x1f1   :  { %p396_p9 = scmp.ne.s32.totalorder %s580_s5, %s395_s28  ;;  %p399_p10 = scmp.lt.u32.totalorder %s395_s28, %s580_s5 }
 0x1f3   :  { %p401_p11 = pnand %p399_p10, %p396_p9 }
 0x1f5   :  { %404 = shalt.err (!%p401_p11)
}
 0x1f6   :  { %228 = dma.vmem_to_hbm [thread:$0]  %s226_s23, 128, %s580_s5, [#allocation10]  }
 0x1f7   :  { %s285_s3 = spop %284  ;;  %s405_s11 = scalar_lea.vmem %s236_s9, 128 }
 0x1f8   :  { %v204_v45 = vstv %s285_s3  ;;  %p406_p12 = scmp.ne.s32.totalorder %s236_s9, %s405_s11  ;;  %p410_p13 = scmp.lt.s32.totalorder %s236_s9, %s236_s9 }
 0x1f9   :  { %206 = vst [vmem:[#allocation11] sm:$0xff] %v204_v45  ;;  %p411_p0 = scmp.lt.s32.totalorder %s405_s11, %s405_s11 }
 0x1fb   :  { %p412_p1 = por %p411_p0, %p410_p13 }
 0x1fd   :  { %p413_p2 = pnand %p412_p1, %p406_p12 }
 0x1ff   :  { %416 = shalt.err (!%p413_p2)
}
 0x200   :  { %s417_s13 = scalar_lea.hbm %s581_s6, 128 }
 0x201   :  { %p418_p3 = scmp.ne.s32.totalorder %s581_s6, %s417_s13  ;;  %p421_p4 = scmp.lt.u32.totalorder %s417_s13, %s581_s6 }
 0x203   :  { %p423_p5 = pnand %p421_p4, %p418_p3 }
 0x205   :  { %426 = shalt.err (!%p423_p5)
}
 0x206   :  { %238 = dma.vmem_to_hbm [thread:$0]  %s236_s9, 128, %s581_s6, [#allocation10]  }
 0x207   :  { %431 = dma.done.wait [#allocation4], 256  }
 0x208   :  { %432 = vsyncadd [#allocation4], 4294967040 }
 0x209   :  { %433 = dma.done.wait [#allocation10], 256  }
 0x20a   :  { %434 = vsyncadd [#allocation10], 4294967040 }
 0x20b   :  { %248 = vsyncpa [#allocation3], 1 }
 0x20c   :  { %249 = vsyncpa [#allocation6], 1 }
 0x20d   :  { %250 = vsyncpa [#allocation4], 1 }
 0x20e   :  { %251 = vsyncpa [#allocation10], 1 }

</bundles_post_ra>
